<compile_context>
chip_gen: v6e
topology: v6e:2x2x1
jax: 0.10.0
libtpu: 0.0.40
codegen_flags: <defaults>
</compile_context>

<pallas_src>
import jax
import jax.numpy as jnp
from jax.experimental import pallas as pl
from jax.experimental.pallas import tpu as pltpu


def _nbsgd_kernel_packed(wr_ref, o_ref, acc_lo_ref, acc_hi_ref):
    """Packed-bf16 path.

    wr_ref     : (P, tb, ts) uint32 -- per-token packed pair of bf16 contributions
                 (class 2p in the low 16 bits, class 2p+1 in the high 16 bits).
    o_ref      : (tb, C_pad) f32    -- output logits for this batch block.
    acc_lo/hi  : (P, tb, ts) f32    -- lane-dense running partial sums.
    """
    s = pl.program_id(1)

    u = wr_ref[...]
    # bf16 -> f32 is just a zero-extension of the mantissa, so placing the bf16
    # bit pattern in the top half of a u32 and bitcasting yields the exact f32
    # value.  Shift / mask / bitcast are all VPU / no-op -- free under the DMA.
    lo = pltpu.bitcast(jnp.left_shift(u, jnp.uint32(16)), jnp.float32)   # classes 2p
    hi = pltpu.bitcast(u & jnp.uint32(0xFFFF0000), jnp.float32)          # classes 2p+1

    @pl.when(s == 0)
    def _():
        # Direct assign on the first seq step: saves one full zero-init store
        # pass over the accumulators per batch block.
        acc_lo_ref[...] = lo
        acc_hi_ref[...] = hi

    @pl.when(s != 0)
    def _():
        acc_lo_ref[...] += lo
        acc_hi_ref[...] += hi

    @pl.when(s == pl.num_programs(1) - 1)
    def _():
        # One cross-lane reduction per class, once at the very end.  The tiny
        # (tb, 1) column stores are negligible bytes.
        for p in range(acc_lo_ref.shape[0]):
            o_ref[:, 2 * p:2 * p + 1] = jnp.sum(acc_lo_ref[p], axis=-1, keepdims=True)
            o_ref[:, 2 * p + 1:2 * p + 2] = jnp.sum(acc_hi_ref[p], axis=-1, keepdims=True)


def _nbsgd_kernel_f32(wr_ref, o_ref, acc_ref):
    """Bit-exact f32 path (pack_bf16=False).

    wr_ref : (C, tb, ts) f32 -- fused per-token contributions, lanes = seq tile.
    o_ref  : (tb, C)     f32 -- output logits for this batch block.
    acc_ref: (C, tb, ts) f32 -- lane-dense running partial sum.
    """
    s = pl.program_id(1)
    x = wr_ref[...]

    @pl.when(s == 0)
    def _():
        acc_ref[...] = x

    @pl.when(s != 0)
    def _():
        acc_ref[...] += x

    @pl.when(s == pl.num_programs(1) - 1)
    def _():
        for c in range(acc_ref.shape[0]):
            o_ref[:, c:c + 1] = jnp.sum(acc_ref[c], axis=-1, keepdims=True)


def _pick_tiles(B, S, batch_tile, seq_tile):
    ts = min(seq_tile, S)
    assert S % ts == 0 and (ts == S or ts % 128 == 0), (
        "S must be a multiple of the sequence tile (pad the sequence with id 0)")
    tb = min(batch_tile, B)
    # Prefer >= 2 batch blocks so v7x can shard the parallel axis across both
    # TensorCores (no-op on single-TC v5e/v6e).
    if tb == B and B >= 16 and B % 16 == 0:
        tb = B // 2
    assert B % tb == 0 and (tb == B or tb % 8 == 0), (
        "batch tile must divide B and be a multiple of 8 (or the full batch)")
    return tb, ts


def dotprod_nb_forward(feat_idx, w_table, r_table, *, w_adj=0.4, r_adj=10.0,
                       seq_tile=2048, batch_tile=256, pack_bf16=True):
    """Forward pass of DotProdNB.  Returns (B, n_classes) float32 logits."""
    B, S = feat_idx.shape
    C = r_table.shape[1]

    # Weights-only algebraic fusion: (w + w_adj) * r / r_adj.  Row 0 stays zero
    # because r_table[0] == 0 (padding row), matching the PyTorch module.
    wr_table = ((w_table[:, 0] + w_adj)[:, None] * r_table) * (1.0 / r_adj)  # (V+1, C)

    tb, ts = _pick_tiles(B, S, batch_tile, seq_tile)
    grid = (B // tb, S // ts)

    if pack_bf16:
        # Pad the class axis to even so classes pack pairwise into u32.
        C_pad = C + (C % 2)
        if C_pad != C:
            wr_table = jnp.concatenate(
                [wr_table, jnp.zeros((wr_table.shape[0], 1), jnp.float32)], axis=1)
        P = C_pad // 2
        bits = jax.lax.bitcast_convert_type(
            wr_table.astype(jnp.bfloat16), jnp.uint16).astype(jnp.uint32)    # (V+1, C_pad)
        packed = bits[:, 0::2] | (bits[:, 1::2] << jnp.uint32(16))           # (V+1, P) u32
        # Lane-dense gather of the *packed* table: (P, B, S) u32, 4 B/token.
        # TODO(synk): move this gather into the kernel (VMEM-resident table +
        # streamed feat_idx) to cut the gathered-slab HBM round trip entirely.
        wr_g = jnp.take(packed.T, feat_idx, axis=1)                          # (P, B, S)
        kernel = _nbsgd_kernel_packed
        in_block = (P, tb, ts)
        scratch = [pltpu.VMEM((P, tb, ts), jnp.float32),
                   pltpu.VMEM((P, tb, ts), jnp.float32)]
    else:
        C_pad = C
        wr_g = jnp.take(wr_table.T, feat_idx, axis=1)                        # (C, B, S) f32
        kernel = _nbsgd_kernel_f32
        in_block = (C, tb, ts)
        scratch = [pltpu.VMEM((C, tb, ts), jnp.float32)]

    # Explicit VMEM budget: double-buffered input + accumulators + output block.
    in_bytes = in_block[0] * in_block[1] * in_block[2] * 4
    acc_bytes = len(scratch) * in_bytes
    live = 2 * in_bytes + acc_bytes + 2 * tb * C_pad * 4
    assert live <= (56 << 20), (
        f"tile config needs ~{live >> 20} MiB VMEM; shrink batch_tile/seq_tile "
        "(v7x has 64 MiB VMEM per TensorCore)")
    vmem_limit = int(min(max(live + (4 << 20), 32 << 20), 64 << 20))

    out = pl.pallas_call(
        kernel,
        out_shape=jax.ShapeDtypeStruct((B, C_pad), jnp.float32),
        grid_spec=pltpu.PrefetchScalarGridSpec(
            num_scalar_prefetch=0,
            grid=grid,                                  # (parallel batch, seq reduction)
            in_specs=[pl.BlockSpec(in_block, lambda b, s: (0, b, s))],
            # Same output block across the reduction axis -> resident in VMEM,
            # written only at the last seq step.
            out_specs=pl.BlockSpec((tb, C_pad), lambda b, s: (b, 0)),
            scratch_shapes=scratch,
        ),
        compiler_params=pltpu.CompilerParams(
            dimension_semantics=("parallel", "arbitrary"),
            vmem_limit_bytes=vmem_limit),
    )(wr_g)

    return out[:, :C] if C_pad != C else out


def _reference(feat_idx, w_table, r_table, w_adj, r_adj):
    w = w_table[feat_idx] + w_adj       # (B, S, 1)
    r = r_table[feat_idx]               # (B, S, C)
    return (w * r).sum(axis=1) / r_adj


def _reference_bf16(feat_idx, w_table, r_table, w_adj, r_adj):
    """Reference using the bf16-quantized fused table (the packed kernel's numerics)."""
    wr = ((w_table[:, 0] + w_adj)[:, None] * r_table) * (1.0 / r_adj)
    wr = wr.astype(jnp.bfloat16).astype(jnp.float32)
    return wr[feat_idx].sum(axis=1)


def _calc_r(y_i, x_sign, y):
    """jnp re-implementation of calc_r for deterministic synthetic r."""
    p = x_sign[y == y_i].sum(axis=0) + 1.0
    q = x_sign[y != y_i].sum(axis=0) + 1.0
    return jnp.log((p / p.sum()) / (q / q.sum()))


if __name__ == "__main__":
    key = jax.random.PRNGKey(0)
    vocab_size = 1024      # synthetic (the real module uses 200000)
    n_classes = 2
    B, S = 8, 512
    w_adj, r_adj = 0.4, 10.0

    k_w, k_x, k_y, k_idx = jax.random.split(key, 4)

    # w embedding: (V+1, 1), uniform(-0.1, 0.1), padding row 0 zeroed.
    w_table = jax.random.uniform(k_w, (vocab_size + 1, 1),
                                 minval=-0.1, maxval=0.1, dtype=jnp.float32)
    w_table = w_table.at[0].set(0.0)

    # Synthetic "training data" to build the naive-Bayes log-count ratio r,
    # then r embedding = [zeros(1, C); r]  (as in the PyTorch __init__).
    n_docs = 64
    X = (jax.random.uniform(k_x, (n_docs, vocab_size)) < 0.05).astype(jnp.float32)
    y = jax.random.randint(k_y, (n_docs,), 0, n_classes)
    x_sign = jnp.sign(X)
    r = jnp.stack([_calc_r(i, x_sign, y) for i in range(n_classes)], axis=1)
    r_table = jnp.concatenate(
        [jnp.zeros((1, n_classes), jnp.float32), r.astype(jnp.float32)], axis=0)

    # Input: (B, S) feature ids in [0, vocab_size]; id 0 == padding.
    feat_idx = jax.random.randint(k_idx, (B, S), 0, vocab_size + 1,
                                  dtype=jnp.int32)

    ref = _reference(feat_idx, w_table, r_table, w_adj, r_adj)
    ref_q = _reference_bf16(feat_idx, w_table, r_table, w_adj, r_adj)

    # Default packed-bf16 path (single-slab grid for these small shapes).
    out = jax.block_until_ready(
        dotprod_nb_forward(feat_idx, w_table, r_table, w_adj=w_adj, r_adj=r_adj))
    assert out.shape == (B, n_classes), out.shape
    # Tight check against the bf16-quantized reference (same table numerics).
    assert jnp.allclose(out, ref_q, atol=1e-3, rtol=1e-3), (out, ref_q)
    # Loose check against the exact f32 module semantics (one bf16 rounding/term).
    assert jnp.allclose(out, ref, atol=5e-2, rtol=5e-2), (out, ref)

    # Multi-step sequence-reduction path (grid = (1, 4)) to exercise the
    # accumulator assign / add / finalize logic.
    out_tiled = jax.block_until_ready(
        dotprod_nb_forward(feat_idx, w_table, r_table, w_adj=w_adj, r_adj=r_adj,
                           seq_tile=128))
    assert jnp.allclose(out_tiled, ref_q, atol=1e-3, rtol=1e-3), (out_tiled, ref_q)

    # Bit-exact f32 path.
    out_f32 = jax.block_until_ready(
        dotprod_nb_forward(feat_idx, w_table, r_table, w_adj=w_adj, r_adj=r_adj,
                           seq_tile=128, pack_bf16=False))
    assert jnp.allclose(out_f32, ref, atol=2e-5, rtol=2e-5), (out_f32, ref)

    print("KERNEL_OK")
</pallas_src>

<mosaic_0001>
module attributes {stable_mosaic.version = 11 : i64} {
  func.func @_nbsgd_kernel_packed(%arg0: i32, %arg1: i32, %arg2: memref<1x8x512xi32, #tpu.memory_space<vmem>>, %arg3: memref<8x2xf32, #tpu.memory_space<vmem>>, %arg4: memref<1x8x512xf32, #tpu.memory_space<vmem>>, %arg5: memref<1x8x512xf32, #tpu.memory_space<vmem>>) attributes {dimension_semantics = [#tpu.dimension_semantics<parallel>, #tpu.dimension_semantics<arbitrary>], iteration_bounds = array<i64: 1, 1>, scalar_prefetch = 0 : i64, scratch_operands = 2 : i64, tpu.core_type = #tpu.core_type<tc>, window_params = [{transform_indices = @transform_0, window_bounds = array<i64: 1, 8, 512>}, {transform_indices = @transform_1, window_bounds = array<i64: 8, 2>}]} {
    %c0 = arith.constant 0 : index
    %c0_0 = arith.constant 0 : index
    %c0_1 = arith.constant 0 : index
    %0 = vector.load %arg2[%c0, %c0_0, %c0_1] : memref<1x8x512xi32, #tpu.memory_space<vmem>>, vector<1x8x512xi32>
    %c16_i32 = arith.constant 16 : i32
    %1 = vector.broadcast %c16_i32 : i32 to vector<1x8x512xi32>
    %2 = arith.shli %0, %1 : vector<1x8x512xi32>
    %3 = tpu.bitcast %2 : vector<1x8x512xi32> -> vector<1x8x512xf32>
    %c-65536_i32 = arith.constant -65536 : i32
    %4 = vector.broadcast %c-65536_i32 : i32 to vector<1x8x512xi32>
    %5 = arith.andi %0, %4 : vector<1x8x512xi32>
    %6 = tpu.bitcast %5 : vector<1x8x512xi32> -> vector<1x8x512xf32>
    %c0_i32 = arith.constant 0 : i32
    %7 = arith.cmpi eq, %arg1, %c0_i32 : i32
    %8 = arith.extui %7 : i1 to i32
    %c0_i32_2 = arith.constant 0 : i32
    %9 = arith.cmpi ne, %8, %c0_i32_2 : i32
    scf.if %9 {
      %c0_7 = arith.constant 0 : index
      %c0_8 = arith.constant 0 : index
      %c0_9 = arith.constant 0 : index
      %16 = vector.load %arg4[%c0_7, %c0_8, %c0_9] : memref<1x8x512xf32, #tpu.memory_space<vmem>>, vector<1x8x512xf32>
      tpu.vector_store %arg4[%c0_7, %c0_8, %c0_9], %3 {strides = array<i32>} : memref<1x8x512xf32, #tpu.memory_space<vmem>>, vector<1x8x512xf32>,
      %c0_10 = arith.constant 0 : index
      %c0_11 = arith.constant 0 : index
      %c0_12 = arith.constant 0 : index
      %17 = vector.load %arg5[%c0_10, %c0_11, %c0_12] : memref<1x8x512xf32, #tpu.memory_space<vmem>>, vector<1x8x512xf32>
      tpu.vector_store %arg5[%c0_10, %c0_11, %c0_12], %6 {strides = array<i32>} : memref<1x8x512xf32, #tpu.memory_space<vmem>>, vector<1x8x512xf32>,
    } else {
    }
    %c0_i32_3 = arith.constant 0 : i32
    %10 = arith.cmpi ne, %arg1, %c0_i32_3 : i32
    %11 = arith.extui %10 : i1 to i32
    %c0_i32_4 = arith.constant 0 : i32
    %12 = arith.cmpi ne, %11, %c0_i32_4 : i32
    scf.if %12 {
      %c0_7 = arith.constant 0 : index
      %c0_8 = arith.constant 0 : index
      %c0_9 = arith.constant 0 : index
      %16 = vector.load %arg4[%c0_7, %c0_8, %c0_9] : memref<1x8x512xf32, #tpu.memory_space<vmem>>, vector<1x8x512xf32>
      %17 = arith.addf %16, %3 : vector<1x8x512xf32>
      %c0_10 = arith.constant 0 : index
      %c0_11 = arith.constant 0 : index
      %c0_12 = arith.constant 0 : index
      %18 = vector.load %arg4[%c0_10, %c0_11, %c0_12] : memref<1x8x512xf32, #tpu.memory_space<vmem>>, vector<1x8x512xf32>
      tpu.vector_store %arg4[%c0_10, %c0_11, %c0_12], %17 {strides = array<i32>} : memref<1x8x512xf32, #tpu.memory_space<vmem>>, vector<1x8x512xf32>,
      %c0_13 = arith.constant 0 : index
      %c0_14 = arith.constant 0 : index
      %c0_15 = arith.constant 0 : index
      %19 = vector.load %arg5[%c0_13, %c0_14, %c0_15] : memref<1x8x512xf32, #tpu.memory_space<vmem>>, vector<1x8x512xf32>
      %20 = arith.addf %19, %6 : vector<1x8x512xf32>
      %c0_16 = arith.constant 0 : index
      %c0_17 = arith.constant 0 : index
      %c0_18 = arith.constant 0 : index
      %21 = vector.load %arg5[%c0_16, %c0_17, %c0_18] : memref<1x8x512xf32, #tpu.memory_space<vmem>>, vector<1x8x512xf32>
      tpu.vector_store %arg5[%c0_16, %c0_17, %c0_18], %20 {strides = array<i32>} : memref<1x8x512xf32, #tpu.memory_space<vmem>>, vector<1x8x512xf32>,
    } else {
    }
    %c0_i32_5 = arith.constant 0 : i32
    %13 = arith.cmpi eq, %arg1, %c0_i32_5 : i32
    %14 = arith.extui %13 : i1 to i32
    %c0_i32_6 = arith.constant 0 : i32
    %15 = arith.cmpi ne, %14, %c0_i32_6 : i32
    scf.if %15 {
      %c0_7 = arith.constant 0 : index
      %c0_8 = arith.constant 0 : index
      %c0_9 = arith.constant 0 : index
      %16 = vector.load %arg4[%c0_7, %c0_8, %c0_9] : memref<1x8x512xf32, #tpu.memory_space<vmem>>, vector<1x8x512xf32>
      %17 = vector.shape_cast %16 : vector<1x8x512xf32> to vector<8x512xf32>
      %cst = arith.constant dense<0.000000e+00> : vector<8xf32>
      %18 = vector.multi_reduction <add>, %17, %cst [1] : vector<8x512xf32> to vector<8xf32>
      %19 = vector.shape_cast %18 : vector<8xf32> to vector<8x1xf32>
      %c0_10 = arith.constant 0 : index
      %c0_11 = arith.constant 0 : index
      %20 = vector.load %arg3[%c0_10, %c0_11] : memref<8x2xf32, #tpu.memory_space<vmem>>, vector<8x1xf32>
      tpu.vector_store %arg3[%c0_10, %c0_11], %19 {strides = array<i32>} : memref<8x2xf32, #tpu.memory_space<vmem>>, vector<8x1xf32>,
      %c0_12 = arith.constant 0 : index
      %c0_13 = arith.constant 0 : index
      %c0_14 = arith.constant 0 : index
      %21 = vector.load %arg5[%c0_12, %c0_13, %c0_14] : memref<1x8x512xf32, #tpu.memory_space<vmem>>, vector<1x8x512xf32>
      %22 = vector.shape_cast %21 : vector<1x8x512xf32> to vector<8x512xf32>
      %cst_15 = arith.constant dense<0.000000e+00> : vector<8xf32>
      %23 = vector.multi_reduction <add>, %22, %cst_15 [1] : vector<8x512xf32> to vector<8xf32>
      %24 = vector.shape_cast %23 : vector<8xf32> to vector<8x1xf32>
      %c0_16 = arith.constant 0 : index
      %c1 = arith.constant 1 : index
      %25 = vector.load %arg3[%c0_16, %c1] : memref<8x2xf32, #tpu.memory_space<vmem>>, vector<8x1xf32>
      tpu.vector_store %arg3[%c0_16, %c1], %24 {strides = array<i32>} : memref<8x2xf32, #tpu.memory_space<vmem>>, vector<8x1xf32>,
    } else {
    }
    return
  }
  func.func @transform_0(%arg0: i32, %arg1: i32) -> (i32, i32, i32) {
    %c0_i32 = arith.constant 0 : i32
    %c0_i32_0 = arith.constant 0 : i32
    return %c0_i32, %arg0, %arg1 : i32, i32, i32
  }
  func.func @transform_1(%arg0: i32, %arg1: i32) -> (i32, i32) {
    %c0_i32 = arith.constant 0 : i32
    %c0_i32_0 = arith.constant 0 : i32
    return %arg0, %c0_i32 : i32, i32
  }
}

</mosaic_0001>

<bundles_post_ra>
// kernel: tpu_custom_call.1
= control target key start
LH: loop header
LB: loop body
LE: loop exit
PB: predicated region body
PF: predicated region fallthrough
CT: control target
= control target key end

     0   :  { %6 = vsyncpa [#allocation5], 0  ;;  %s133_s6 = smov [#allocation4]   ;;  %s153_s0 = inlined_call_operand.hbm [shape: u32[1,8,512], index: 0, kind: input, shape index: {}]   ;;  %s154_s1 = inlined_call_operand.vmem [shape: f32[8,2], index: 1, kind: output, shape index: {}]  }
   0x1   :  { %s13_s7 = sshll.u32 %s133_s6, 4  ;;  %s14_s7 = int_to_ptr.vmem [resolvable:$true] %s13_s7 }
   0x2   :  { %s119_s8 = scalar_lea.vmem %s14_s7, 512  ;;  %p124_p1 = scmp.lt.s32.totalorder %s14_s7, %s14_s7 }
   0x3   :  { %p120_p0 = scmp.ne.s32.totalorder %s14_s7, %s119_s8  ;;  %p125_p2 = scmp.lt.s32.totalorder %s119_s8, %s119_s8 }
   0x5   :  { %p126_p3 = por %p125_p2, %p124_p1 }
   0x7   :  { %p127_p4 = pnand %p126_p3, %p120_p0 }
   0x9   :  { %130 = shalt.err (!%p127_p4)
}
   0xa   :  { %16 = dma.hbm_to_vmem [thread:$0]  %s153_s0, 512, %s14_s7, [#allocation5]  }
   0xb   :  { %131 = dma.done.wait [#allocation5], 512  }
   0xc   :  { %132 = vsyncadd [#allocation5], 4294966784  ;;  %v20_v0 = vld [vmem:[#allocation4] sm:$0xff]  ;;  %v21_v1 = vld [vmem:[#allocation4 + $0x8] sm:$0xff]  ;;  %vm92_vm0 = vcmask 7168   ;;  %vm103_vm1 = vcmask 15368  }
   0xd   :  { %v22_v2 = vld [vmem:[#allocation4 + $0x10] sm:$0xff]  ;;  %v23_v3 = vld [vmem:[#allocation4 + $0x18] sm:$0xff]  ;;  %v24_v4 = vshll.u32 %v20_v0, 16  ;;  %v25_v5 = vshll.u32 %v21_v1, 16  ;;  %v32_v7 = vand.u32 4294901760, %v20_v0  ;;  %v33_v8 = vand.u32 4294901760, %v21_v1 }
   0xe   :  { %v26_v6 = vshll.u32 %v22_v2, 16  ;;  %v34_v9 = vand.u32 4294901760, %v22_v2  ;;  %v27_v10 = vshll.u32 %v23_v3, 16  ;;  %v35_v14 = vand.u32 4294901760, %v23_v3 }
   0xf   :  { %v87_v11 = vadd.f32 %v25_v5, %v24_v4  ;;  %v98_v12 = vadd.f32 %v33_v8, %v32_v7 }
  0x11   :  { %v88_v13 = vadd.f32 %v87_v11, %v26_v6  ;;  %v99_v15 = vadd.f32 %v98_v12, %v34_v9 }
  0x13   :  { %v89_v16 = vadd.f32 %v88_v13, %v27_v10  ;;  %v100_v17 = vadd.f32 %v99_v15, %v35_v14 }
  0x15   :  { %90 = vadd.xlane.f32.xlu0 %v89_v16 }
  0x19   :  { %101 = vadd.xlane.f32.xlu0 %v100_v17 }
  0x9e   :  { %v91_v18 = vpop.xlane.xlu0 %90 }
  0x9f   :  { %93 = vst.msk [vmem:[%s154_s1] sm:$0xff] %vm92_vm0, %v91_v18 }
  0xa2   :  { %v102_v19 = vpop.xlane.xlu0 %101 }
  0xa3   :  { %104 = vst.msk [vmem:[%s154_s1] sm:$0xff] %vm103_vm1, %v102_v19 }
  0xa4   :  { %109 = vsyncpa [#allocation5], 1 }

</bundles_post_ra>
